<compile_context>
chip_gen: v7x
topology: tpu7x:2x2x1
jax: 0.10.0
libtpu: 0.0.40
codegen_flags: <defaults>
</compile_context>

<pallas_src>
import jax
import jax.numpy as jnp
from jax.experimental import pallas as pl
from jax.experimental.pallas import tpu as pltpu

VOCAB = 256          # vocab_size
EMBED = 128          # embedding_size (== LSTM hidden_size in the module)
NUM_LAYERS = 2       # n_hidden in the PyTorch module == nn.LSTM num_layers

COMPUTE_DTYPE = jnp.bfloat16   # weight / matmul-input dtype (f32 accumulation)


# --------------------------------------------------------------------------
# Kernel: one grid step == one decode step (one token).  Weights stay VMEM
# resident across the whole grid; h/c are carried in the output blocks.
# --------------------------------------------------------------------------
def _decoder_kernel(tok_ref,                          # (T,) int32 in SMEM (prefetch)
                    emb_ref, h0_ref, c0_ref,          # VMEM inputs
                    w_ref, b_ref, wout_ref, bout_ref,
                    logp_ref, hn_ref, cn_ref):        # VMEM outputs
    L, E = h0_ref.shape
    t = pl.program_id(0)

    # Seed the VMEM-resident state on the first step.  Constant out index_maps
    # keep hn/cn in the same VMEM buffers for all T steps (writeback at end).
    @pl.when(t == 0)
    def _():
        hn_ref[...] = h0_ref[...]
        cn_ref[...] = c0_ref[...]

    # --- output = F.relu(embedding(input)) ----------------------------------
    tok = tok_ref[t]
    x = jnp.maximum(emb_ref[pl.ds(tok, 1), :], 0.0)             # (1, E) f32

    # --- stacked LSTM, one timestep (seq_len = 1, batch = 1) ----------------
    h_prev = hn_ref[...]                                        # (L, E) f32
    c_prev = cn_ref[...]
    new_h, new_c = [], []
    for l in range(L):                                          # static, L = 2
        h = h_prev[l:l + 1, :]                                  # (1, E)
        c = c_prev[l:l + 1, :]
        # Fused gate matmul: [x, h] @ [W_ih^T; W_hh^T] + (b_ih + b_hh)
        xh = jnp.concatenate([x, h], axis=-1).astype(COMPUTE_DTYPE)   # (1, 2E)
        gates = (jnp.dot(xh, w_ref[l], preferred_element_type=jnp.float32)
                 + b_ref[l])                                    # (1, 4E) f32
        # Gate layout was reordered at prep time to (i, f, o, g):
        # one sigmoid over the contiguous 3E lanes, one tanh over the last E.
        s = jax.nn.sigmoid(gates[:, 0:3 * E])
        g = jnp.tanh(gates[:, 3 * E:4 * E])
        i_g = s[:, 0 * E:1 * E]
        f_g = s[:, 1 * E:2 * E]
        o_g = s[:, 2 * E:3 * E]
        c_new = f_g * c + i_g * g
        h_new = o_g * jnp.tanh(c_new)
        new_h.append(h_new)
        new_c.append(c_new)
        x = h_new                                               # feeds next layer
    hn_ref[...] = jnp.concatenate(new_h, axis=0)                # dense (L, E) store
    cn_ref[...] = jnp.concatenate(new_c, axis=0)

    # --- output = log_softmax(Linear(output[0]), dim=1) ---------------------
    logits = (jnp.dot(x.astype(COMPUTE_DTYPE), wout_ref[...],
                      preferred_element_type=jnp.float32)
              + bout_ref[...])                                  # (1, V) f32
    m = jnp.max(logits, axis=-1, keepdims=True)
    z = jnp.log(jnp.sum(jnp.exp(logits - m), axis=-1, keepdims=True))
    logp_ref[...] = logits - m - z


# --------------------------------------------------------------------------
# One-time parameter preparation (hoisted out of the decode loop)
# --------------------------------------------------------------------------
def prep_params(params):
    """Pre-transpose / concat / reorder weights once (outside the decode loop)."""
    L, four_e, E = params["w_ih"].shape
    V = params["w_out"].shape[0]
    w_ih_t = jnp.swapaxes(params["w_ih"], 1, 2)                 # (L, E, 4E)
    w_hh_t = jnp.swapaxes(params["w_hh"], 1, 2)                 # (L, E, 4E)
    w_cat = jnp.concatenate([w_ih_t, w_hh_t], axis=1)           # (L, 2E, 4E)
    b_cat = (params["b_ih"] + params["b_hh"]).reshape(L, 1, four_e)

    # Reorder gates (i, f, g, o) -> (i, f, o, g) so sigmoid/tanh each run once.
    def reorder(a):
        return jnp.concatenate(
            [a[..., 0 * E:1 * E], a[..., 1 * E:2 * E],
             a[..., 3 * E:4 * E], a[..., 2 * E:3 * E]], axis=-1)

    return dict(
        emb=params["embedding"].astype(jnp.float32),            # (V, E), VMEM resident
        w=reorder(w_cat).astype(COMPUTE_DTYPE),                 # (L, 2E, 4E)
        b=reorder(b_cat).astype(jnp.float32),                   # (L, 1, 4E)
        w_out=params["w_out"].T.astype(COMPUTE_DTYPE),          # (E, V)
        b_out=params["b_out"].reshape(1, V).astype(jnp.float32),# (1, V)
    )


# --------------------------------------------------------------------------
# Forward wrappers
# --------------------------------------------------------------------------
def _decode_impl(tokens, hidden, prepped):
    """T decode steps with parameters VMEM-resident for the whole call.

    tokens: (T,) int32; hidden: (h0, c0), each (L, 1, E) (PyTorch layout).
    Returns logp (T, V) and the final hidden state ((L,1,E), (L,1,E)).
    """
    h0, c0 = hidden
    L, _, E = h0.shape
    V = prepped["w_out"].shape[1]
    T = tokens.shape[0]
    tokens = tokens.astype(jnp.int32)
    h0f = h0.reshape(L, E).astype(jnp.float32)
    c0f = c0.reshape(L, E).astype(jnp.float32)

    const2 = lambda t, tok: (0, 0)
    const3 = lambda t, tok: (0, 0, 0)
    # Weight/bias/emb blocks have constant index maps => DMA'd once, resident.
    # (VMEM footprint ~1.4 MB even double-buffered, far under every chip's limit.)
    grid_spec = pltpu.PrefetchScalarGridSpec(
        num_scalar_prefetch=1,                     # token ids -> SMEM
        grid=(T,),
        in_specs=[
            pl.BlockSpec((V, E), const2),              # embedding table (resident)
            pl.BlockSpec((L, E), const2),              # h0
            pl.BlockSpec((L, E), const2),              # c0
            pl.BlockSpec((L, 2 * E, 4 * E), const3),   # fused [W_ih^T; W_hh^T]
            pl.BlockSpec((L, 1, 4 * E), const3),       # fused b_ih + b_hh
            pl.BlockSpec((E, V), const2),              # W_out^T
            pl.BlockSpec((1, V), const2),              # b_out
        ],
        out_specs=(
            pl.BlockSpec((1, V), lambda t, tok: (t, 0)),   # per-step log-probs
            pl.BlockSpec((L, E), const2),                  # h_n (state carrier)
            pl.BlockSpec((L, E), const2),                  # c_n (state carrier)
        ),
    )

    param_bytes = (prepped["w"].size * 2 + prepped["w_out"].size * 2
                   + prepped["emb"].size * 4
                   + prepped["b"].size * 4 + prepped["b_out"].size * 4)
    cost = pl.CostEstimate(
        flops=int(T * 2 * (L * (2 * E) * (4 * E) + E * V)),
        transcendentals=int(T * (L * 5 * E + V + 1)),
        bytes_accessed=int(param_bytes + 4 * (4 * L * E + T * V + T)),
    )

    logp, hn, cn = pl.pallas_call(
        _decoder_kernel,
        out_shape=(jax.ShapeDtypeStruct((T, V), jnp.float32),
                   jax.ShapeDtypeStruct((L, E), jnp.float32),
                   jax.ShapeDtypeStruct((L, E), jnp.float32)),
        grid_spec=grid_spec,
        # h0 -> h_n, c0 -> c_n (input indices count the scalar-prefetch operand).
        input_output_aliases={2: 1, 3: 2},
        compiler_params=pltpu.CompilerParams(
            dimension_semantics=("arbitrary",)),       # sequential recurrence
        cost_estimate=cost,
    )(tokens, prepped["emb"], h0f, c0f, prepped["w"], prepped["b"],
      prepped["w_out"], prepped["b_out"])
    return logp, (hn.reshape(L, 1, E), cn.reshape(L, 1, E))


rnn_decoder_decode = jax.jit(_decode_impl)


def rnn_decoder_forward(token, hidden, prepped):
    """Single step — exact analogue of RNNDecoderModule.forward(input, hidden)."""
    tokens = jnp.asarray(token, jnp.int32).reshape(1)
    logp, hidden = rnn_decoder_decode(tokens, hidden, prepped)
    return logp, hidden                                  # logp: (1, V)


# --------------------------------------------------------------------------
# Pure-JAX f32 reference (original params, PyTorch gate order) for verification
# --------------------------------------------------------------------------
def reference_forward(token, hidden, params):
    h, c = hidden                                        # (L, 1, E) each
    L, four_e, E = params["w_ih"].shape
    x = jnp.maximum(params["embedding"][token].reshape(1, E), 0.0)
    hs, cs = [], []
    for l in range(L):
        gates = (x @ params["w_ih"][l].T + params["b_ih"][l]
                 + h[l] @ params["w_hh"][l].T + params["b_hh"][l])   # (1, 4E)
        i = jax.nn.sigmoid(gates[:, 0 * E:1 * E])
        f = jax.nn.sigmoid(gates[:, 1 * E:2 * E])
        g = jnp.tanh(gates[:, 2 * E:3 * E])
        o = jax.nn.sigmoid(gates[:, 3 * E:4 * E])
        c_new = f * c[l] + i * g
        h_new = o * jnp.tanh(c_new)
        hs.append(h_new)
        cs.append(c_new)
        x = h_new
    logits = x @ params["w_out"].T + params["b_out"]
    logp = jax.nn.log_softmax(logits, axis=1)
    return logp, (jnp.stack(hs, 0), jnp.stack(cs, 0))


def reference_decode(tokens, hidden, params):
    logps = []
    for tok in tokens:
        logp, hidden = reference_forward(tok, hidden, params)
        logps.append(logp)
    return jnp.concatenate(logps, axis=0), hidden


def init_params(key, vocab, embed, n_layers):
    ks = jax.random.split(key, 7)
    bound = 1.0 / jnp.sqrt(embed)
    u = lambda k, shape: jax.random.uniform(k, shape, jnp.float32, -bound, bound)
    return dict(
        embedding=jax.random.normal(ks[0], (vocab, embed), jnp.float32),
        # layer-0 input_size == embedding_size == hidden_size -> shared shapes
        w_ih=u(ks[1], (n_layers, 4 * embed, embed)),
        w_hh=u(ks[2], (n_layers, 4 * embed, embed)),
        b_ih=u(ks[3], (n_layers, 4 * embed)),
        b_hh=u(ks[4], (n_layers, 4 * embed)),
        w_out=u(ks[5], (vocab, embed)),
        b_out=u(ks[6], (vocab,)),
    )


if __name__ == "__main__":
    key = jax.random.PRNGKey(0)
    pk, hk, ck, tk = jax.random.split(key, 4)
    params = init_params(pk, VOCAB, EMBED, NUM_LAYERS)
    prepped = prep_params(params)                  # one-time layout prep
    h0 = jax.random.normal(hk, (NUM_LAYERS, 1, EMBED), jnp.float32)
    c0 = jax.random.normal(ck, (NUM_LAYERS, 1, EMBED), jnp.float32)

    # --- single step: exact RNNDecoderModule.forward semantics --------------
    token = jnp.array(7, dtype=jnp.int32)
    logp1, (hn1, cn1) = rnn_decoder_forward(token, (h0, c0), prepped)
    jax.block_until_ready((logp1, hn1, cn1))
    ref_logp1, (ref_hn1, ref_cn1) = reference_forward(token, (h0, c0), params)
    assert logp1.shape == (1, VOCAB) and hn1.shape == (NUM_LAYERS, 1, EMBED)
    assert jnp.allclose(logp1, ref_logp1, atol=5e-2, rtol=5e-2)
    assert jnp.allclose(hn1, ref_hn1, atol=5e-2, rtol=5e-2)
    assert jnp.allclose(cn1, ref_cn1, atol=5e-2, rtol=5e-2)

    # --- T-step decode with the in-kernel loop (weights DMA'd once) ---------
    T = 8
    tokens = jax.random.randint(tk, (T,), 0, VOCAB, dtype=jnp.int32)
    logp, (hn, cn) = rnn_decoder_decode(tokens, (h0, c0), prepped)
    jax.block_until_ready((logp, hn, cn))
    ref_logp, (ref_hn, ref_cn) = reference_decode(tokens, (h0, c0), params)
    assert logp.shape == (T, VOCAB)
    assert jnp.allclose(logp, ref_logp, atol=7e-2, rtol=7e-2)
    assert jnp.allclose(hn, ref_hn, atol=7e-2, rtol=7e-2)
    assert jnp.allclose(cn, ref_cn, atol=7e-2, rtol=7e-2)
    print("KERNEL_OK")
</pallas_src>

<mosaic_0001>
module attributes {stable_mosaic.version = 11 : i64} {
  func.func @_decoder_kernel(%arg0: i32, %arg1: memref<1xi32, #tpu.memory_space<smem>>, %arg2: memref<256x128xf32, #tpu.memory_space<vmem>>, %arg3: memref<2x128xf32, #tpu.memory_space<vmem>>, %arg4: memref<2x128xf32, #tpu.memory_space<vmem>>, %arg5: memref<2x256x512xbf16, #tpu.memory_space<vmem>>, %arg6: memref<2x1x512xf32, #tpu.memory_space<vmem>>, %arg7: memref<128x256xbf16, #tpu.memory_space<vmem>>, %arg8: memref<1x256xf32, #tpu.memory_space<vmem>>, %arg9: memref<1x256xf32, #tpu.memory_space<vmem>>, %arg10: memref<2x128xf32, #tpu.memory_space<vmem>>, %arg11: memref<2x128xf32, #tpu.memory_space<vmem>>) attributes {dimension_semantics = [#tpu.dimension_semantics<arbitrary>], iteration_bounds = array<i64: 1>, scalar_prefetch = 1 : i64, scratch_operands = 0 : i64, tpu.core_type = #tpu.core_type<tc>, window_params = [{pipeline_mode = #tpu.pipeline_mode<synchronous>, transform_indices = @transform_0, window_bounds = array<i64: 256, 128>}, {pipeline_mode = #tpu.pipeline_mode<synchronous>, transform_indices = @transform_1, window_bounds = array<i64: 2, 128>}, {pipeline_mode = #tpu.pipeline_mode<synchronous>, transform_indices = @transform_2, window_bounds = array<i64: 2, 128>}, {pipeline_mode = #tpu.pipeline_mode<synchronous>, transform_indices = @transform_3, window_bounds = array<i64: 2, 256, 512>}, {pipeline_mode = #tpu.pipeline_mode<synchronous>, transform_indices = @transform_4, window_bounds = array<i64: 2, 1, 512>}, {pipeline_mode = #tpu.pipeline_mode<synchronous>, transform_indices = @transform_5, window_bounds = array<i64: 128, 256>}, {pipeline_mode = #tpu.pipeline_mode<synchronous>, transform_indices = @transform_6, window_bounds = array<i64: 1, 256>}, {transform_indices = @transform_7, window_bounds = array<i64: 1, 256>}, {pipeline_mode = #tpu.pipeline_mode<synchronous>, transform_indices = @transform_8, window_bounds = array<i64: 2, 128>}, {pipeline_mode = #tpu.pipeline_mode<synchronous>, transform_indices = @transform_9, window_bounds = array<i64: 2, 128>}]} {
    %c0_i32 = arith.constant 0 : i32
    %0 = arith.cmpi eq, %arg0, %c0_i32 : i32
    %1 = arith.extui %0 : i1 to i32
    %c0_i32_0 = arith.constant 0 : i32
    %2 = arith.cmpi ne, %1, %c0_i32_0 : i32
    scf.if %2 {
      %c0_33 = arith.constant 0 : index
      %c0_34 = arith.constant 0 : index
      %85 = vector.load %arg3[%c0_33, %c0_34] : memref<2x128xf32, #tpu.memory_space<vmem>>, vector<2x128xf32>
      %c0_35 = arith.constant 0 : index
      %c0_36 = arith.constant 0 : index
      %86 = vector.load %arg10[%c0_35, %c0_36] : memref<2x128xf32, #tpu.memory_space<vmem>>, vector<2x128xf32>
      tpu.vector_store %arg10[%c0_35, %c0_36], %85 {strides = array<i32>} : memref<2x128xf32, #tpu.memory_space<vmem>>, vector<2x128xf32>,
      %c0_37 = arith.constant 0 : index
      %c0_38 = arith.constant 0 : index
      %87 = vector.load %arg4[%c0_37, %c0_38] : memref<2x128xf32, #tpu.memory_space<vmem>>, vector<2x128xf32>
      %c0_39 = arith.constant 0 : index
      %c0_40 = arith.constant 0 : index
      %88 = vector.load %arg11[%c0_39, %c0_40] : memref<2x128xf32, #tpu.memory_space<vmem>>, vector<2x128xf32>
      tpu.vector_store %arg11[%c0_39, %c0_40], %87 {strides = array<i32>} : memref<2x128xf32, #tpu.memory_space<vmem>>, vector<2x128xf32>,
    } else {
    }
    %3 = arith.index_cast %arg0 : i32 to index
    %4 = memref.load %arg1[%3] : memref<1xi32, #tpu.memory_space<smem>>
    %5 = arith.index_cast %4 : i32 to index
    %c0 = arith.constant 0 : index
    %6 = vector.load %arg2[%5, %c0] : memref<256x128xf32, #tpu.memory_space<vmem>>, vector<1x128xf32>
    %cst = arith.constant 0.000000e+00 : f32
    %7 = vector.broadcast %cst : f32 to vector<1x128xf32>
    %8 = arith.maximumf %6, %7 : vector<1x128xf32>
    %c0_1 = arith.constant 0 : index
    %c0_2 = arith.constant 0 : index
    %9 = vector.load %arg10[%c0_1, %c0_2] : memref<2x128xf32, #tpu.memory_space<vmem>>, vector<2x128xf32>
    %c0_3 = arith.constant 0 : index
    %c0_4 = arith.constant 0 : index
    %10 = vector.load %arg11[%c0_3, %c0_4] : memref<2x128xf32, #tpu.memory_space<vmem>>, vector<2x128xf32>
    %11 = vector.extract_strided_slice %9 {offsets = [0, 0], sizes = [1, 128], strides = [1, 1]} : vector<2x128xf32> to vector<1x128xf32>
    %12 = vector.extract_strided_slice %10 {offsets = [0, 0], sizes = [1, 128], strides = [1, 1]} : vector<2x128xf32> to vector<1x128xf32>
    %13 = tpu.concatenate %8, %11 in 1 : vector<1x128xf32>, vector<1x128xf32> -> vector<1x256xf32>
    %14 = arith.truncf %13 : vector<1x256xf32> to vector<1x256xbf16>
    %c0_5 = arith.constant 0 : index
    %c0_6 = arith.constant 0 : index
    %c0_7 = arith.constant 0 : index
    %15 = vector.load %arg5[%c0_5, %c0_6, %c0_7] : memref<2x256x512xbf16, #tpu.memory_space<vmem>>, vector<1x256x512xbf16>
    %16 = vector.shape_cast %15 : vector<1x256x512xbf16> to vector<256x512xbf16>
    %cst_8 = arith.constant dense<0.000000e+00> : vector<1x512xf32>
    %17 = tpu.matmul %14, %16, %cst_8 {dimension_numbers = #tpu.dot_dimension_numbers<[1], [0], [0], [1], [0, 0, 1, 1], [], []>} : vector<1x256xbf16>, vector<256x512xbf16>, vector<1x512xf32> -> vector<1x512xf32>
    %c0_9 = arith.constant 0 : index
    %c0_10 = arith.constant 0 : index
    %c0_11 = arith.constant 0 : index
    %18 = vector.load %arg6[%c0_9, %c0_10, %c0_11] : memref<2x1x512xf32, #tpu.memory_space<vmem>>, vector<1x1x512xf32>
    %19 = vector.shape_cast %18 : vector<1x1x512xf32> to vector<1x512xf32>
    %20 = arith.addf %17, %19 : vector<1x512xf32>
    %21 = vector.extract_strided_slice %20 {offsets = [0, 0], sizes = [1, 384], strides = [1, 1]} : vector<1x512xf32> to vector<1x384xf32>
    %22 = arith.negf %21 : vector<1x384xf32>
    %23 = math.exp %22 : vector<1x384xf32>
    %cst_12 = arith.constant 1.000000e+00 : f32
    %24 = vector.broadcast %cst_12 : f32 to vector<1x384xf32>
    %25 = arith.addf %24, %23 : vector<1x384xf32>
    %26 = arith.divf %24, %25 : vector<1x384xf32>
    %27 = vector.extract_strided_slice %20 {offsets = [0, 384], sizes = [1, 128], strides = [1, 1]} : vector<1x512xf32> to vector<1x128xf32>
    %28 = math.tanh %27 : vector<1x128xf32>
    %29 = vector.extract_strided_slice %26 {offsets = [0, 0], sizes = [1, 128], strides = [1, 1]} : vector<1x384xf32> to vector<1x128xf32>
    %30 = vector.extract_strided_slice %26 {offsets = [0, 128], sizes = [1, 128], strides = [1, 1]} : vector<1x384xf32> to vector<1x128xf32>
    %31 = vector.extract_strided_slice %26 {offsets = [0, 256], sizes = [1, 128], strides = [1, 1]} : vector<1x384xf32> to vector<1x128xf32>
    %32 = arith.mulf %30, %12 : vector<1x128xf32>
    %33 = arith.mulf %29, %28 : vector<1x128xf32>
    %34 = arith.addf %32, %33 : vector<1x128xf32>
    %35 = math.tanh %34 : vector<1x128xf32>
    %36 = arith.mulf %31, %35 : vector<1x128xf32>
    %37 = vector.extract_strided_slice %9 {offsets = [1, 0], sizes = [1, 128], strides = [1, 1]} : vector<2x128xf32> to vector<1x128xf32>
    %38 = vector.extract_strided_slice %10 {offsets = [1, 0], sizes = [1, 128], strides = [1, 1]} : vector<2x128xf32> to vector<1x128xf32>
    %39 = tpu.concatenate %36, %37 in 1 : vector<1x128xf32>, vector<1x128xf32> -> vector<1x256xf32>
    %40 = arith.truncf %39 : vector<1x256xf32> to vector<1x256xbf16>
    %c1 = arith.constant 1 : index
    %c0_13 = arith.constant 0 : index
    %c0_14 = arith.constant 0 : index
    %41 = vector.load %arg5[%c1, %c0_13, %c0_14] : memref<2x256x512xbf16, #tpu.memory_space<vmem>>, vector<1x256x512xbf16>
    %42 = vector.shape_cast %41 : vector<1x256x512xbf16> to vector<256x512xbf16>
    %cst_15 = arith.constant dense<0.000000e+00> : vector<1x512xf32>
    %43 = tpu.matmul %40, %42, %cst_15 {dimension_numbers = #tpu.dot_dimension_numbers<[1], [0], [0], [1], [0, 0, 1, 1], [], []>} : vector<1x256xbf16>, vector<256x512xbf16>, vector<1x512xf32> -> vector<1x512xf32>
    %c1_16 = arith.constant 1 : index
    %c0_17 = arith.constant 0 : index
    %c0_18 = arith.constant 0 : index
    %44 = vector.load %arg6[%c1_16, %c0_17, %c0_18] : memref<2x1x512xf32, #tpu.memory_space<vmem>>, vector<1x1x512xf32>
    %45 = vector.shape_cast %44 : vector<1x1x512xf32> to vector<1x512xf32>
    %46 = arith.addf %43, %45 : vector<1x512xf32>
    %47 = vector.extract_strided_slice %46 {offsets = [0, 0], sizes = [1, 384], strides = [1, 1]} : vector<1x512xf32> to vector<1x384xf32>
    %48 = arith.negf %47 : vector<1x384xf32>
    %49 = math.exp %48 : vector<1x384xf32>
    %cst_19 = arith.constant 1.000000e+00 : f32
    %50 = vector.broadcast %cst_19 : f32 to vector<1x384xf32>
    %51 = arith.addf %50, %49 : vector<1x384xf32>
    %52 = arith.divf %50, %51 : vector<1x384xf32>
    %53 = vector.extract_strided_slice %46 {offsets = [0, 384], sizes = [1, 128], strides = [1, 1]} : vector<1x512xf32> to vector<1x128xf32>
    %54 = math.tanh %53 : vector<1x128xf32>
    %55 = vector.extract_strided_slice %52 {offsets = [0, 0], sizes = [1, 128], strides = [1, 1]} : vector<1x384xf32> to vector<1x128xf32>
    %56 = vector.extract_strided_slice %52 {offsets = [0, 128], sizes = [1, 128], strides = [1, 1]} : vector<1x384xf32> to vector<1x128xf32>
    %57 = vector.extract_strided_slice %52 {offsets = [0, 256], sizes = [1, 128], strides = [1, 1]} : vector<1x384xf32> to vector<1x128xf32>
    %58 = arith.mulf %56, %38 : vector<1x128xf32>
    %59 = arith.mulf %55, %54 : vector<1x128xf32>
    %60 = arith.addf %58, %59 : vector<1x128xf32>
    %61 = math.tanh %60 : vector<1x128xf32>
    %62 = arith.mulf %57, %61 : vector<1x128xf32>
    %63 = tpu.concatenate %36, %62 in 0 : vector<1x128xf32>, vector<1x128xf32> -> vector<2x128xf32>
    %c0_20 = arith.constant 0 : index
    %c0_21 = arith.constant 0 : index
    %64 = vector.load %arg10[%c0_20, %c0_21] : memref<2x128xf32, #tpu.memory_space<vmem>>, vector<2x128xf32>
    tpu.vector_store %arg10[%c0_20, %c0_21], %63 {strides = array<i32>} : memref<2x128xf32, #tpu.memory_space<vmem>>, vector<2x128xf32>,
    %65 = tpu.concatenate %34, %60 in 0 : vector<1x128xf32>, vector<1x128xf32> -> vector<2x128xf32>
    %c0_22 = arith.constant 0 : index
    %c0_23 = arith.constant 0 : index
    %66 = vector.load %arg11[%c0_22, %c0_23] : memref<2x128xf32, #tpu.memory_space<vmem>>, vector<2x128xf32>
    tpu.vector_store %arg11[%c0_22, %c0_23], %65 {strides = array<i32>} : memref<2x128xf32, #tpu.memory_space<vmem>>, vector<2x128xf32>,
    %67 = arith.truncf %62 : vector<1x128xf32> to vector<1x128xbf16>
    %c0_24 = arith.constant 0 : index
    %c0_25 = arith.constant 0 : index
    %68 = vector.load %arg7[%c0_24, %c0_25] : memref<128x256xbf16, #tpu.memory_space<vmem>>, vector<128x256xbf16>
    %cst_26 = arith.constant dense<0.000000e+00> : vector<1x256xf32>
    %69 = tpu.matmul %67, %68, %cst_26 {dimension_numbers = #tpu.dot_dimension_numbers<[1], [0], [0], [1], [0, 0, 1, 1], [], []>} : vector<1x128xbf16>, vector<128x256xbf16>, vector<1x256xf32> -> vector<1x256xf32>
    %c0_27 = arith.constant 0 : index
    %c0_28 = arith.constant 0 : index
    %70 = vector.load %arg8[%c0_27, %c0_28] : memref<1x256xf32, #tpu.memory_space<vmem>>, vector<1x256xf32>
    %71 = arith.addf %69, %70 : vector<1x256xf32>
    %cst_29 = arith.constant dense<0xFF800000> : vector<1xf32>
    %72 = vector.multi_reduction <maximumf>, %71, %cst_29 [1] : vector<1x256xf32> to vector<1xf32>
    %73 = vector.shape_cast %72 : vector<1xf32> to vector<1x1xf32>
    %74 = vector.broadcast %73 : vector<1x1xf32> to vector<1x256xf32>
    %75 = arith.subf %71, %74 : vector<1x256xf32>
    %76 = math.exp %75 : vector<1x256xf32>
    %cst_30 = arith.constant dense<0.000000e+00> : vector<1xf32>
    %77 = vector.multi_reduction <add>, %76, %cst_30 [1] : vector<1x256xf32> to vector<1xf32>
    %78 = vector.shape_cast %77 : vector<1xf32> to vector<1x1xf32>
    %79 = math.log %78 : vector<1x1xf32>
    %80 = vector.broadcast %73 : vector<1x1xf32> to vector<1x256xf32>
    %81 = arith.subf %71, %80 : vector<1x256xf32>
    %82 = vector.broadcast %79 : vector<1x1xf32> to vector<1x256xf32>
    %83 = arith.subf %81, %82 : vector<1x256xf32>
    %c0_31 = arith.constant 0 : index
    %c0_32 = arith.constant 0 : index
    %84 = vector.load %arg9[%c0_31, %c0_32] : memref<1x256xf32, #tpu.memory_space<vmem>>, vector<1x256xf32>
    tpu.vector_store %arg9[%c0_31, %c0_32], %83 {strides = array<i32>} : memref<1x256xf32, #tpu.memory_space<vmem>>, vector<1x256xf32>,
    return
  }
  func.func @transform_0(%arg0: i32, %arg1: memref<1xi32, #tpu.memory_space<smem>>) -> (i32, i32) {
    %c0_i32 = arith.constant 0 : i32
    %c0_i32_0 = arith.constant 0 : i32
    %c0_i32_1 = arith.constant 0 : i32
    return %c0_i32, %c0_i32_0 : i32, i32
  }
  func.func @transform_1(%arg0: i32, %arg1: memref<1xi32, #tpu.memory_space<smem>>) -> (i32, i32) {
    %c0_i32 = arith.constant 0 : i32
    %c0_i32_0 = arith.constant 0 : i32
    %c0_i32_1 = arith.constant 0 : i32
    return %c0_i32, %c0_i32_0 : i32, i32
  }
  func.func @transform_2(%arg0: i32, %arg1: memref<1xi32, #tpu.memory_space<smem>>) -> (i32, i32) {
    %c0_i32 = arith.constant 0 : i32
    %c0_i32_0 = arith.constant 0 : i32
    %c0_i32_1 = arith.constant 0 : i32
    return %c0_i32, %c0_i32_0 : i32, i32
  }
  func.func @transform_3(%arg0: i32, %arg1: memref<1xi32, #tpu.memory_space<smem>>) -> (i32, i32, i32) {
    %c0_i32 = arith.constant 0 : i32
    %c0_i32_0 = arith.constant 0 : i32
    %c0_i32_1 = arith.constant 0 : i32
    %c0_i32_2 = arith.constant 0 : i32
    return %c0_i32, %c0_i32_0, %c0_i32_1 : i32, i32, i32
  }
  func.func @transform_4(%arg0: i32, %arg1: memref<1xi32, #tpu.memory_space<smem>>) -> (i32, i32, i32) {
    %c0_i32 = arith.constant 0 : i32
    %c0_i32_0 = arith.constant 0 : i32
    %c0_i32_1 = arith.constant 0 : i32
    %c0_i32_2 = arith.constant 0 : i32
    return %c0_i32, %c0_i32_0, %c0_i32_1 : i32, i32, i32
  }
  func.func @transform_5(%arg0: i32, %arg1: memref<1xi32, #tpu.memory_space<smem>>) -> (i32, i32) {
    %c0_i32 = arith.constant 0 : i32
    %c0_i32_0 = arith.constant 0 : i32
    %c0_i32_1 = arith.constant 0 : i32
    return %c0_i32, %c0_i32_0 : i32, i32
  }
  func.func @transform_6(%arg0: i32, %arg1: memref<1xi32, #tpu.memory_space<smem>>) -> (i32, i32) {
    %c0_i32 = arith.constant 0 : i32
    %c0_i32_0 = arith.constant 0 : i32
    %c0_i32_1 = arith.constant 0 : i32
    return %c0_i32, %c0_i32_0 : i32, i32
  }
  func.func @transform_7(%arg0: i32, %arg1: memref<1xi32, #tpu.memory_space<smem>>) -> (i32, i32) {
    %c0_i32 = arith.constant 0 : i32
    %c0_i32_0 = arith.constant 0 : i32
    return %arg0, %c0_i32 : i32, i32
  }
  func.func @transform_8(%arg0: i32, %arg1: memref<1xi32, #tpu.memory_space<smem>>) -> (i32, i32) {
    %c0_i32 = arith.constant 0 : i32
    %c0_i32_0 = arith.constant 0 : i32
    %c0_i32_1 = arith.constant 0 : i32
    return %c0_i32, %c0_i32_0 : i32, i32
  }
  func.func @transform_9(%arg0: i32, %arg1: memref<1xi32, #tpu.memory_space<smem>>) -> (i32, i32) {
    %c0_i32 = arith.constant 0 : i32
    %c0_i32_0 = arith.constant 0 : i32
    %c0_i32_1 = arith.constant 0 : i32
    return %c0_i32, %c0_i32_0 : i32, i32
  }
}

</mosaic_0001>

<bundles_post_ra>
// kernel: _decode_impl.1
= control target key start
LH: loop header
LB: loop body
LE: loop exit
PB: predicated region body
PF: predicated region fallthrough
CT: control target
= control target key end

     0   :  { %17 = vsyncpa [#allocation5], 0  ;;  %s2062_s0 = inlined_call_operand.<no memory space> [shape: s32[1], index: 0, kind: input, shape index: {}]   ;;  %s2063_s1 = inlined_call_operand.hbm [shape: f32[256,128], index: 1, kind: input, shape index: {}]   ;;  %s2064_s2 = inlined_call_operand.vmem [shape: f32[2,128], index: 2, kind: input, shape index: {}, may-alias: {2,9}]   ;;  %s2065_s3 = inlined_call_operand.vmem [shape: f32[2,128], index: 3, kind: input, shape index: {}, may-alias: {3,10}]   ;;  %s2066_s4 = inlined_call_operand.hbm [shape: bf16[2,256,512], index: 4, kind: input, shape index: {}]   ;;  %s2067_s5 = inlined_call_operand.vmem [shape: f32[2,1,512], index: 5, kind: input, shape index: {}]   ;;  %s2068_s6 = inlined_call_operand.hbm [shape: bf16[128,256], index: 6, kind: input, shape index: {}]   ;;  %s2069_s7 = inlined_call_operand.vmem [shape: f32[1,256], index: 7, kind: input, shape index: {}]   ;;  %s2070_s8 = inlined_call_operand.hbm [shape: f32[1,256], index: 8, kind: output, shape index: {0}]   ;;  %s2071_s9 = inlined_call_operand.vmem [shape: f32[2,128], index: 9, kind: output, shape index: {1}, may-alias: {2,9}]   ;;  %s2072_s10 = inlined_call_operand.vmem [shape: f32[2,128], index: 10, kind: output, shape index: {2}, may-alias: {3,10}]  }
   0x1   :  { %18 = vsyncpa [#allocation8], 0 }
   0x2   :  { %19 = vsyncpa [#allocation6], 0  ;;  %s1862_s13 = smov [#allocation7]   ;;  %s1768_s17 = scalar_lea.hbm %s2066_s4, 16384 }
   0x3   :  { %s41_s14 = sshll.u32 %s1862_s13, 4  ;;  %p1769_p0 = scmp.ne.s32.totalorder %s2066_s4, %s1768_s17  ;;  %s42_s14 = int_to_ptr.vmem [resolvable:$true] %s41_s14 }
   0x4   :  { %p1772_p1 = scmp.lt.u32.totalorder %s1768_s17, %s2066_s4 }
   0x6   :  { %p1774_p2 = pnand %p1772_p1, %p1769_p0 }
   0x8   :  { %1777 = shalt.err (!%p1774_p2)
}
   0x9   :  { %s1778_s22 = scalar_lea.vmem %s42_s14, 16384  ;;  %p1783_p4 = scmp.lt.s32.totalorder %s42_s14, %s42_s14 }
   0xa   :  { %p1779_p3 = scmp.ne.s32.totalorder %s42_s14, %s1778_s22  ;;  %p1784_p5 = scmp.lt.s32.totalorder %s1778_s22, %s1778_s22 }
   0xc   :  { %p1785_p6 = por %p1784_p5, %p1783_p4 }
   0xe   :  { %p1786_p7 = pnand %p1785_p6, %p1779_p3 }
  0x10   :  { %1789 = shalt.err (!%p1786_p7)
}
  0x11   :  { %s1863_s23 = smov 256   ;;  %s1864_s24 = smov 16  }
  0x12   :  { %47 = dma.hbm_to_vmem [thread:$0]  %s2066_s4, 16384, %s42_s14, [#allocation8], %s1863_s23, %s1863_s23, %s1864_s24  }
  0x13   :  { %s1865_s27 = smov [#allocation4]   ;;  %s1790_s11 = scalar_lea.hbm %s2063_s1, 4096 }
  0x14   :  { %s25_s28 = sshll.u32 %s1865_s27, 4  ;;  %p1791_p8 = scmp.ne.s32.totalorder %s2063_s1, %s1790_s11  ;;  %s26_s28 = int_to_ptr.vmem [resolvable:$true] %s25_s28 }
  0x15   :  { %p1794_p9 = scmp.lt.u32.totalorder %s1790_s11, %s2063_s1 }
  0x17   :  { %p1796_p10 = pnand %p1794_p9, %p1791_p8 }
  0x19   :  { %1799 = shalt.err (!%p1796_p10)
}
  0x1a   :  { %s1800_s17 = scalar_lea.vmem %s26_s28, 4096  ;;  %p1805_p12 = scmp.lt.s32.totalorder %s26_s28, %s26_s28 }
  0x1b   :  { %p1801_p11 = scmp.ne.s32.totalorder %s26_s28, %s1800_s17  ;;  %p1806_p13 = scmp.lt.s32.totalorder %s1800_s17, %s1800_s17 }
  0x1d   :  { %p1807_p0 = por %p1806_p13, %p1805_p12 }
  0x1f   :  { %p1808_p1 = pnand %p1807_p0, %p1801_p11 }
  0x21   :  { %1811 = shalt.err (!%p1808_p1)
}
  0x22   :  { %s1866_s4 = smov 128   ;;  %s1867_s14 = smov 8  }
  0x23   :  { %31 = dma.hbm_to_vmem [thread:$0]  %s2063_s1, 4096, %s26_s28, [#allocation5], %s1866_s4, %s1866_s4, %s1867_s14  }
  0x24   :  { %s1868_s20 = smov [#allocation9]   ;;  %s1812_s24 = scalar_lea.hbm %s2068_s6, 2048 }
  0x25   :  { %s55_s21 = sshll.u32 %s1868_s20, 4  ;;  %p1813_p2 = scmp.ne.s32.totalorder %s2068_s6, %s1812_s24  ;;  %s56_s21 = int_to_ptr.vmem [resolvable:$true] %s55_s21 }
  0x26   :  { %p1816_p3 = scmp.lt.u32.totalorder %s1812_s24, %s2068_s6 }
  0x28   :  { %p1818_p4 = pnand %p1816_p3, %p1813_p2 }
  0x2a   :  { %1821 = shalt.err (!%p1818_p4)
}
  0x2b   :  { %s1822_s30 = scalar_lea.vmem %s56_s21, 2048  ;;  %p1827_p6 = scmp.lt.s32.totalorder %s56_s21, %s56_s21 }
  0x2c   :  { %p1823_p5 = scmp.ne.s32.totalorder %s56_s21, %s1822_s30  ;;  %p1828_p7 = scmp.lt.s32.totalorder %s1822_s30, %s1822_s30 }
  0x2e   :  { %p1829_p8 = por %p1828_p7, %p1827_p6 }
  0x30   :  { %p1830_p9 = pnand %p1829_p8, %p1823_p5 }
  0x32   :  { %1833 = shalt.err (!%p1830_p9)
}
  0x33   :  { %61 = dma.hbm_to_vmem [thread:$0]  %s2068_s6, 2048, %s56_s21, [#allocation8], %s1866_s4, %s1866_s4, %s1867_s14  }
  0x34   :  { %1856 = dma.done.wait [#allocation5], 4096  }
  0x35   :  { %1857 = vsyncadd [#allocation5], 4294963200 }
  0x36   :  { %1858 = dma.done.wait [#allocation8], 18432  }
  0x37   :  { %1859 = vsyncadd [#allocation8], 4294948864  ;;  %v1514_v0 = vld [vmem:[#allocation7 + $0x4] ss:$16 sps:$4 sm:$0xff]   ;;  %v1516_v1 = vld [vmem:[#allocation7] ss:$16 sps:$4 sm:$0xff]  }
  0x38   :  { %496 = vmatprep.subr.bf16.mxu0 %v1514_v0  ;;  %v1517_v2 = vld [vmem:[#allocation7 + $0x24] ss:$16 sps:$4 sm:$0xff]   ;;  %v1519_v3 = vld [vmem:[#allocation7 + $0x20] ss:$16 sps:$4 sm:$0xff]   ;;  %v1525_v5 = vld [vmem:[#allocation7 + $0xc] ss:$16 sps:$4 sm:$0xff]  }
  0x39   :  { %497 = vmatpush1.bf16.msra.mxu0 %v1516_v1  ;;  %v1520_v4 = vld [vmem:[#allocation7 + $0x44] ss:$16 sps:$4 sm:$0xff]   ;;  %v1528_v6 = vld [vmem:[#allocation7 + $0x8] ss:$16 sps:$4 sm:$0xff]   ;;  %v1522_v7 = vld [vmem:[#allocation7 + $0x40] ss:$16 sps:$4 sm:$0xff]   ;;  %537 = vmatprep.subr.bf16.mxu1 %v1525_v5 }
  0x3a   :  { %498 = vmatprep.subr.bf16.mxu0 %v1517_v2  ;;  %v1523_v8 = vld [vmem:[#allocation7 + $0x64] ss:$16 sps:$4 sm:$0xff]   ;;  %538 = vmatpush1.bf16.msra.mxu1 %v1528_v6  ;;  %v1531_v9 = vld [vmem:[#allocation7 + $0x2c] ss:$16 sps:$4 sm:$0xff]   ;;  %v1534_v10 = vld [vmem:[#allocation7 + $0x28] ss:$16 sps:$4 sm:$0xff]  }
  0x3b   :  { %539 = vmatprep.subr.bf16.mxu1 %v1531_v9  ;;  %v1527_v11 = vld [vmem:[#allocation7 + $0x60] ss:$16 sps:$4 sm:$0xff]   ;;  %v1529_v12 = vld [vmem:[#allocation7 + $0x84] ss:$16 sps:$4 sm:$0xff]   ;;  %v1537_v13 = vld [vmem:[#allocation7 + $0x4c] ss:$16 sps:$4 sm:$0xff]  }
  0x3c   :  { %v1540_v14 = vld [vmem:[#allocation7 + $0x48] ss:$16 sps:$4 sm:$0xff]   ;;  %v1543_v15 = vld [vmem:[#allocation7 + $0x6c] ss:$16 sps:$4 sm:$0xff]   ;;  %v1533_v16 = vld [vmem:[#allocation7 + $0x80] ss:$16 sps:$4 sm:$0xff]  }
  0x3d   :  { %499 = vmatpush1.bf16.msra.mxu0 %v1519_v3  ;;  %v1535_v17 = vld [vmem:[#allocation7 + $0xa4] ss:$16 sps:$4 sm:$0xff]   ;;  %v1546_v18 = vld [vmem:[#allocation7 + $0x68] ss:$16 sps:$4 sm:$0xff]   ;;  %v1549_v19 = vld [vmem:[#allocation7 + $0x8c] ss:$16 sps:$4 sm:$0xff]  }
  0x3e   :  { %500 = vmatprep.subr.bf16.mxu0 %v1520_v4  ;;  %540 = vmatpush1.bf16.msra.mxu1 %v1534_v10  ;;  %v1539_v20 = vld [vmem:[#allocation7 + $0xa0] ss:$16 sps:$4 sm:$0xff]   ;;  %v1541_v21 = vld [vmem:[#allocation7 + $0xc4] ss:$16 sps:$4 sm:$0xff]   ;;  %v1552_v22 = vld [vmem:[#allocation7 + $0x88] ss:$16 sps:$4 sm:$0xff]  }
  0x3f   :  { %541 = vmatprep.subr.bf16.mxu1 %v1537_v13  ;;  %v1555_v23 = vld [vmem:[#allocation7 + $0xac] ss:$16 sps:$4 sm:$0xff]   ;;  %v1545_v24 = vld [vmem:[#allocation7 + $0xc0] ss:$16 sps:$4 sm:$0xff]   ;;  %v1547_v25 = vld [vmem:[#allocation7 + $0xe4] ss:$16 sps:$4 sm:$0xff]  }
  0x40   :  { %v1558_v26 = vld [vmem:[#allocation7 + $0xa8] ss:$16 sps:$4 sm:$0xff]   ;;  %v1561_v27 = vld [vmem:[#allocation7 + $0xcc] ss:$16 sps:$4 sm:$0xff]   ;;  %v1551_v28 = vld [vmem:[#allocation7 + $0xe0] ss:$16 sps:$4 sm:$0xff]  }
  0x41   :  { %501 = vmatpush1.bf16.msra.mxu0 %v1522_v7  ;;  %v1553_v29 = vld [vmem:[#allocation7 + $0x104] ss:$16 sps:$4 sm:$0xff]   ;;  %v1564_v30 = vld [vmem:[#allocation7 + $0xc8] ss:$16 sps:$4 sm:$0xff]   ;;  %v1567_v31 = vld [vmem:[#allocation7 + $0xec] ss:$16 sps:$4 sm:$0xff]  }
  0x42   :  { %502 = vmatprep.subr.bf16.mxu0 %v1523_v8  ;;  %542 = vmatpush1.bf16.msra.mxu1 %v1540_v14  ;;  %v1557_v32 = vld [vmem:[#allocation7 + $0x100] ss:$16 sps:$4 sm:$0xff]   ;;  %v1559_v33 = vld [vmem:[#allocation7 + $0x124] ss:$16 sps:$4 sm:$0xff]   ;;  %v1570_v34 = vld [vmem:[#allocation7 + $0xe8] ss:$16 sps:$4 sm:$0xff]  }
  0x43   :  { %543 = vmatprep.subr.bf16.mxu1 %v1543_v15  ;;  %v1573_v35 = vld [vmem:[#allocation7 + $0x10c] ss:$16 sps:$4 sm:$0xff]   ;;  %v1563_v36 = vld [vmem:[#allocation7 + $0x120] ss:$16 sps:$4 sm:$0xff]   ;;  %v1565_v37 = vld [vmem:[#allocation7 + $0x144] ss:$16 sps:$4 sm:$0xff]  }
  0x44   :  { %v1576_v38 = vld [vmem:[#allocation7 + $0x108] ss:$16 sps:$4 sm:$0xff]   ;;  %v1579_v39 = vld [vmem:[#allocation7 + $0x12c] ss:$16 sps:$4 sm:$0xff]   ;;  %v78_v40 = vld [vmem:[%s2064_s2] sm:$0x3] }
  0x45   :  { %503 = vmatpush1.bf16.msra.mxu0 %v1527_v11  ;;  %v1569_v41 = vld [vmem:[#allocation7 + $0x140] ss:$16 sps:$4 sm:$0xff]   ;;  %79 = vst [vmem:[%s2071_s9] sm:$0x3] %v78_v40  ;;  %v1571_v42 = vld [vmem:[#allocation7 + $0x164] ss:$16 sps:$4 sm:$0xff]   ;;  %s83_s4 = scalar_lea.vmem [#allocation4], %s2062_s0 }
  0x46   :  { %504 = vmatprep.subr.bf16.mxu0 %v1529_v12  ;;  %544 = vmatpush1.bf16.msra.mxu1 %v1546_v18  ;;  %v1582_v43 = vld [vmem:[#allocation7 + $0x128] ss:$16 sps:$4 sm:$0xff]   ;;  %v1585_v44 = vld [vmem:[#allocation7 + $0x14c] ss:$16 sps:$4 sm:$0xff]   ;;  %v1575_v45 = vld [vmem:[#allocation7 + $0x160] ss:$16 sps:$4 sm:$0xff]  }
  0x47   :  { %545 = vmatprep.subr.bf16.mxu1 %v1549_v19  ;;  %v1577_v46 = vld [vmem:[#allocation7 + $0x184] ss:$16 sps:$4 sm:$0xff]   ;;  %v1588_v47 = vld [vmem:[#allocation7 + $0x148] ss:$16 sps:$4 sm:$0xff]   ;;  %v1591_v48 = vld [vmem:[#allocation7 + $0x16c] ss:$16 sps:$4 sm:$0xff]  }
  0x48   :  { %v1581_v50 = vld [vmem:[#allocation7 + $0x180] ss:$16 sps:$4 sm:$0xff]   ;;  %v1583_v52 = vld [vmem:[#allocation7 + $0x1a4] ss:$16 sps:$4 sm:$0xff]   ;;  %v1594_v53 = vld [vmem:[#allocation7 + $0x168] ss:$16 sps:$4 sm:$0xff]  }
  0x49   :  { %505 = vmatpush1.bf16.msra.mxu0 %v1533_v16  ;;  %v1597_v54 = vld [vmem:[#allocation7 + $0x18c] ss:$16 sps:$4 sm:$0xff]   ;;  %v1587_v55 = vld [vmem:[#allocation7 + $0x1a0] ss:$16 sps:$4 sm:$0xff]   ;;  %v1589_v56 = vld [vmem:[#allocation7 + $0x1c4] ss:$16 sps:$4 sm:$0xff]  }
  0x4a   :  { %506 = vmatprep.subr.bf16.mxu0 %v1535_v17  ;;  %546 = vmatpush1.bf16.msra.mxu1 %v1552_v22  ;;  %v1600_v57 = vld [vmem:[#allocation7 + $0x188] ss:$16 sps:$4 sm:$0xff]   ;;  %v1593_v58 = vld [vmem:[#allocation7 + $0x1c0] ss:$16 sps:$4 sm:$0xff]   ;;  %v1601_v59 = vld [vmem:[#allocation7 + $0x1ac] ss:$16 sps:$4 sm:$0xff]  }
  0x4b   :  { %547 = vmatprep.subr.bf16.mxu1 %v1555_v23  ;;  %v1595_v60 = vld [vmem:[#allocation7 + $0x1e4] ss:$16 sps:$4 sm:$0xff]   ;;  %v84_v61 = vld [vmem:[%s83_s4] sm:$0x1]  ;;  %v1603_v62 = vld [vmem:[#allocation7 + $0x1a8] ss:$16 sps:$4 sm:$0xff]  }
  0x4c   :  { %v1972_v49 = vld [vmem:[%s2071_s9] sm:$0x3]  ;;  %v1604_v63 = vld [vmem:[#allocation7 + $0x1cc] ss:$16 sps:$4 sm:$0xff]   ;;  %v85_v1 = vmax.f32 %v84_v61, 0.0  ;;  %vm1127_vm0 = vcmask 1040384  }
  0x4d   :  { %507 = vmatpush1.bf16.msra.mxu0 %v1539_v20  ;;  %v89_v51 = vpack.c.bf16 %v1972_v49, %v1972_v49  ;;  %v1599_v0 = vld [vmem:[#allocation7 + $0x1e0] ss:$16 sps:$4 sm:$0xff]   ;;  %v1606_v2 = vld [vmem:[#allocation7 + $0x1c8] ss:$16 sps:$4 sm:$0xff]   ;;  %v1612_v3 = vld [vmem:[#allocation7 + $0x204] ss:$16 sps:$4 sm:$0xff]  }
  0x4e   :  { %508 = vmatprep.subr.bf16.mxu0 %v1541_v21  ;;  %548 = vmatpush1.bf16.msra.mxu1 %v1558_v26  ;;  %v1607_v4 = vld [vmem:[#allocation7 + $0x1ec] ss:$16 sps:$4 sm:$0xff]   ;;  %v1610_v5 = vld [vmem:[#allocation7 + $0x200] ss:$16 sps:$4 sm:$0xff]   ;;  %v88_v6 = vpack.c.bf16 %v85_v1, %v85_v1  ;;  %v1609_v7 = vld [vmem:[#allocation7 + $0x1e8] ss:$16 sps:$4 sm:$0xff]  }
  0x4f   :  { %549 = vmatprep.subr.bf16.mxu1 %v1561_v27  ;;  %528 = vmatprep.mubr.bf16.mxu0 %v89_v51  ;;  %v1618_v8 = vld [vmem:[#allocation7 + $0x224] ss:$16 sps:$4 sm:$0xff]   ;;  %v1615_v9 = vld [vmem:[#allocation7 + $0x20c] ss:$16 sps:$4 sm:$0xff]   ;;  %v1616_v10 = vld [vmem:[#allocation7 + $0x220] ss:$16 sps:$4 sm:$0xff]  }
  0x50   :  { %569 = vmatprep.mubr.bf16.mxu1 %v89_v51  ;;  %v1613_v11 = vld [vmem:[#allocation7 + $0x208] ss:$16 sps:$4 sm:$0xff]   ;;  %v1624_v12 = vld [vmem:[#allocation7 + $0x244] ss:$16 sps:$4 sm:$0xff]   ;;  %v1621_v13 = vld [vmem:[#allocation7 + $0x22c] ss:$16 sps:$4 sm:$0xff]  }
  0x51   :  { %509 = vmatpush1.bf16.msra.mxu0 %v1545_v24  ;;  %v1622_v14 = vld [vmem:[#allocation7 + $0x240] ss:$16 sps:$4 sm:$0xff]   ;;  %v1619_v15 = vld [vmem:[#allocation7 + $0x228] ss:$16 sps:$4 sm:$0xff]   ;;  %v1630_v16 = vld [vmem:[#allocation7 + $0x264] ss:$16 sps:$4 sm:$0xff]  }
  0x52   :  { %510 = vmatprep.subr.bf16.mxu0 %v1547_v25  ;;  %550 = vmatpush1.bf16.msra.mxu1 %v1564_v30  ;;  %v1627_v17 = vld [vmem:[#allocation7 + $0x24c] ss:$16 sps:$4 sm:$0xff]   ;;  %v1628_v18 = vld [vmem:[#allocation7 + $0x260] ss:$16 sps:$4 sm:$0xff]   ;;  %v1625_v19 = vld [vmem:[#allocation7 + $0x248] ss:$16 sps:$4 sm:$0xff]  }
  0x53   :  { %551 = vmatprep.subr.bf16.mxu1 %v1567_v31  ;;  %v1633_v20 = vld [vmem:[#allocation7 + $0x26c] ss:$16 sps:$4 sm:$0xff]   ;;  %v1631_v21 = vld [vmem:[#allocation7 + $0x268] ss:$16 sps:$4 sm:$0xff]   ;;  %v1636_v22 = vld [vmem:[#allocation7 + $0x284] ss:$16 sps:$4 sm:$0xff]  }
  0x54   :  { %v1639_v23 = vld [vmem:[#allocation7 + $0x28c] ss:$16 sps:$4 sm:$0xff]   ;;  %v1634_v24 = vld [vmem:[#allocation7 + $0x280] ss:$16 sps:$4 sm:$0xff]   ;;  %v1637_v25 = vld [vmem:[#allocation7 + $0x288] ss:$16 sps:$4 sm:$0xff]  }
  0x55   :  { %511 = vmatpush1.bf16.msra.mxu0 %v1551_v28  ;;  %v1642_v26 = vld [vmem:[#allocation7 + $0x2a4] ss:$16 sps:$4 sm:$0xff]   ;;  %v1645_v27 = vld [vmem:[#allocation7 + $0x2ac] ss:$16 sps:$4 sm:$0xff]   ;;  %v1640_v28 = vld [vmem:[#allocation7 + $0x2a0] ss:$16 sps:$4 sm:$0xff]  }
  0x56   :  { %512 = vmatprep.subr.bf16.mxu0 %v1553_v29  ;;  %552 = vmatpush1.bf16.msra.mxu1 %v1570_v34  ;;  %v1643_v29 = vld [vmem:[#allocation7 + $0x2a8] ss:$16 sps:$4 sm:$0xff]   ;;  %v1648_v30 = vld [vmem:[#allocation7 + $0x2c4] ss:$16 sps:$4 sm:$0xff]   ;;  %v1651_v31 = vld [vmem:[#allocation7 + $0x2cc] ss:$16 sps:$4 sm:$0xff]  }
  0x57   :  { %553 = vmatprep.subr.bf16.mxu1 %v1573_v35  ;;  %v1654_v34 = vld [vmem:[#allocation7 + $0x2e4] ss:$16 sps:$4 sm:$0xff]   ;;  %v1657_v35 = vld [vmem:[#allocation7 + $0x2ec] ss:$16 sps:$4 sm:$0xff]   ;;  %v1658_v40 = vld [vmem:[#allocation7 + $0x300] ss:$16 sps:$4 sm:$0xff]  }
  0x58   :  { %v1673_v51 = vld [vmem:[#allocation7 + $0x348] ss:$16 sps:$4 sm:$0xff]   ;;  %v1690_v61 = vld [vmem:[#allocation7 + $0x3a4] ss:$16 sps:$4 sm:$0xff]   ;;  %v1699_v1 = vld [vmem:[#allocation7 + $0x3cc] ss:$16 sps:$4 sm:$0xff]  }
  0x59   :  { %513 = vmatpush1.bf16.msra.mxu0 %v1557_v32  ;;  %v1646_v32 = vld [vmem:[#allocation7 + $0x2c0] ss:$16 sps:$4 sm:$0xff]  }
  0x5a   :  { %514 = vmatprep.subr.bf16.mxu0 %v1559_v33  ;;  %554 = vmatpush1.bf16.msra.mxu1 %v1576_v38  ;;  %v1649_v33 = vld [vmem:[#allocation7 + $0x2c8] ss:$16 sps:$4 sm:$0xff]   ;;  %v1660_v38 = vld [vmem:[#allocation7 + $0x304] ss:$16 sps:$4 sm:$0xff]  }
  0x5b   :  { %555 = vmatprep.subr.bf16.mxu1 %v1579_v39  ;;  %v1663_v39 = vld [vmem:[#allocation7 + $0x30c] ss:$16 sps:$4 sm:$0xff]  }
  0x5d   :  { %515 = vmatpush1.bf16.msra.mxu0 %v1563_v36  ;;  %v1652_v36 = vld [vmem:[#allocation7 + $0x2e0] ss:$16 sps:$4 sm:$0xff]  }
  0x5e   :  { %516 = vmatprep.subr.bf16.mxu0 %v1565_v37  ;;  %556 = vmatpush1.bf16.msra.mxu1 %v1582_v43  ;;  %v1655_v37 = vld [vmem:[#allocation7 + $0x2e8] ss:$16 sps:$4 sm:$0xff]   ;;  %v1666_v43 = vld [vmem:[#allocation7 + $0x324] ss:$16 sps:$4 sm:$0xff]  }
  0x5f   :  { %557 = vmatprep.subr.bf16.mxu1 %v1585_v44  ;;  %v1669_v44 = vld [vmem:[#allocation7 + $0x32c] ss:$16 sps:$4 sm:$0xff]  }
  0x61   :  { %517 = vmatpush1.bf16.msra.mxu0 %v1569_v41  ;;  %v1661_v41 = vld [vmem:[#allocation7 + $0x308] ss:$16 sps:$4 sm:$0xff]  }
  0x62   :  { %518 = vmatprep.subr.bf16.mxu0 %v1571_v42  ;;  %558 = vmatpush1.bf16.msra.mxu1 %v1588_v47  ;;  %v80_v42 = vld [vmem:[%s2065_s3] sm:$0x3]  ;;  %v1672_v47 = vld [vmem:[#allocation7 + $0x344] ss:$16 sps:$4 sm:$0xff]  }
  0x63   :  { %559 = vmatprep.subr.bf16.mxu1 %v1591_v48  ;;  %81 = vst [vmem:[%s2072_s10] sm:$0x3] %v80_v42  ;;  %v1675_v48 = vld [vmem:[#allocation7 + $0x34c] ss:$16 sps:$4 sm:$0xff]  }
  0x65   :  { %519 = vmatpush1.bf16.msra.mxu0 %v1575_v45  ;;  %v1664_v45 = vld [vmem:[#allocation7 + $0x320] ss:$16 sps:$4 sm:$0xff]  }
  0x66   :  { %520 = vmatprep.subr.bf16.mxu0 %v1577_v46  ;;  %560 = vmatpush1.bf16.msra.mxu1 %v1594_v53  ;;  %v1667_v46 = vld [vmem:[#allocation7 + $0x328] ss:$16 sps:$4 sm:$0xff]   ;;  %v1681_v53 = vld [vmem:[#allocation7 + $0x36c] ss:$16 sps:$4 sm:$0xff]  }
  0x67   :  { %561 = vmatprep.subr.bf16.mxu1 %v1597_v54  ;;  %v1676_v54 = vld [vmem:[#allocation7 + $0x360] ss:$16 sps:$4 sm:$0xff]  }
  0x69   :  { %521 = vmatpush1.bf16.msra.mxu0 %v1581_v50  ;;  %v1670_v50 = vld [vmem:[#allocation7 + $0x340] ss:$16 sps:$4 sm:$0xff]  }
  0x6a   :  { %522 = vmatprep.subr.bf16.mxu0 %v1583_v52  ;;  %562 = vmatpush1.bf16.msra.mxu1 %v1600_v57  ;;  %v1678_v52 = vld [vmem:[#allocation7 + $0x364] ss:$16 sps:$4 sm:$0xff]   ;;  %v1687_v57 = vld [vmem:[#allocation7 + $0x38c] ss:$16 sps:$4 sm:$0xff]  }
  0x6b   :  { %563 = vmatprep.subr.bf16.mxu1 %v1601_v59  ;;  %v1685_v59 = vld [vmem:[#allocation7 + $0x388] ss:$16 sps:$4 sm:$0xff]  }
  0x6d   :  { %523 = vmatpush1.bf16.msra.mxu0 %v1587_v55  ;;  %v1679_v55 = vld [vmem:[#allocation7 + $0x368] ss:$16 sps:$4 sm:$0xff]  }
  0x6e   :  { %524 = vmatprep.subr.bf16.mxu0 %v1589_v56  ;;  %564 = vmatpush1.bf16.msra.mxu1 %v1603_v62  ;;  %v1684_v56 = vld [vmem:[#allocation7 + $0x384] ss:$16 sps:$4 sm:$0xff]   ;;  %v1691_v62 = vld [vmem:[#allocation7 + $0x3a8] ss:$16 sps:$4 sm:$0xff]  }
  0x6f   :  { %565 = vmatprep.subr.bf16.mxu1 %v1604_v63  ;;  %v1693_v63 = vld [vmem:[#allocation7 + $0x3ac] ss:$16 sps:$4 sm:$0xff]  }
  0x71   :  { %525 = vmatpush1.bf16.msra.mxu0 %v1593_v58  ;;  %v1682_v58 = vld [vmem:[#allocation7 + $0x380] ss:$16 sps:$4 sm:$0xff]  }
  0x72   :  { %526 = vmatprep.subr.bf16.mxu0 %v1595_v60  ;;  %566 = vmatpush1.bf16.msra.mxu1 %v1606_v2  ;;  %v1688_v60 = vld [vmem:[#allocation7 + $0x3a0] ss:$16 sps:$4 sm:$0xff]  }
  0x73   :  { %567 = vmatprep.subr.bf16.mxu1 %v1607_v4  ;;  %v1694_v2 = vld [vmem:[#allocation7 + $0x3c0] ss:$16 sps:$4 sm:$0xff]   ;;  %v603_v4 = vrot.slane %v1972_v49, 1 }
  0x75   :  { %527 = vmatpush1.bf16.msra.mxu0 %v1599_v0  ;;  %v1696_v0 = vld [vmem:[#allocation7 + $0x3c4] ss:$16 sps:$4 sm:$0xff]  }
  0x76   :  { %1015 = vmatprep.subr.bf16.mxu0 %v1612_v3  ;;  %568 = vmatpush1.bf16.msra.mxu1 %v1609_v7  ;;  %v1697_v3 = vld [vmem:[#allocation7 + $0x3c8] ss:$16 sps:$4 sm:$0xff]   ;;  %v606_v7 = vpack.c.bf16 %v603_v4, %v603_v4  ;;  %v1729_v4 = vld [vmem:[#allocation9 + $0x74] ss:$8 sps:$4 sm:$0xff]  }
  0x77   :  { %1056 = vmatprep.subr.bf16.mxu1 %v1615_v9  ;;  %v1703_v9 = vld [vmem:[#allocation7 + $0x3e8] ss:$16 sps:$4 sm:$0xff]  }
  0x78   :  { %529 = vmatmul.mubr.bf16.vlgmr.msra.gmra.mrb[0].mxu0 %v88_v6 }
  0x79   :  { %1016 = vmatpush1.bf16.msra.mxu0 %v1610_v5  ;;  %570 = vmatmul.mubr.bf16.vlgmr.msra.gmra.mrb[0].mxu1 %v88_v6  ;;  %v1702_v5 = vld [vmem:[#allocation7 + $0x3e4] ss:$16 sps:$4 sm:$0xff]   ;;  %v1705_v6 = vld [vmem:[#allocation7 + $0x3ec] ss:$16 sps:$4 sm:$0xff]  }
  0x7a   :  { %1017 = vmatprep.subr.bf16.mxu0 %v1618_v8  ;;  %1057 = vmatpush1.bf16.msra.mxu1 %v1613_v11  ;;  %v1700_v8 = vld [vmem:[#allocation7 + $0x3e0] ss:$16 sps:$4 sm:$0xff]  }
  0x7b   :  { %1058 = vmatprep.subr.bf16.mxu1 %v1621_v13  ;;  %1047 = vmatprep.mubr.bf16.mxu0 %v606_v7 }
  0x7c   :  { %1088 = vmatprep.mubr.bf16.mxu1 %v606_v7 }
  0x7d   :  { %1018 = vmatpush1.bf16.msra.mxu0 %v1616_v10  ;;  %v476_v10 = vlaneseq }
  0x7e   :  { %1019 = vmatprep.subr.bf16.mxu0 %v1624_v12  ;;  %1059 = vmatpush1.bf16.msra.mxu1 %v1619_v15  ;;  %v154_v12 = vld [vmem:[%s2067_s5] sm:$0xf] }
  0x7f   :  { %1060 = vmatprep.subr.bf16.mxu1 %v1627_v17  ;;  %v1987_v11 = vshrl.u32 %v476_v10, 7  ;;  %vm1325_vm1 = vcmp.lt.s32.totalorder %v476_v10, 256 }
  0x81   :  { %1020 = vmatpush1.bf16.msra.mxu0 %v1622_v14  ;;  %v1990_v49 = vsub.s32 0, %v1987_v11  ;;  %v1996_v13 = vsub.s32 1, %v1987_v11 }
  0x82   :  { %1021 = vmatprep.subr.bf16.mxu0 %v1630_v16  ;;  %1061 = vmatpush1.bf16.msra.mxu1 %v1625_v19  ;;  %v486_v16 = vsub.s32 2, %v1987_v11 }
  0x83   :  { %1062 = vmatprep.subr.bf16.mxu1 %v1633_v20  ;;  %v479_v14 = vrot.slane %v154_v12, %v1990_v49  ;;  %v483_v15 = vrot.slane %v154_v12, %v1996_v13 }
  0x85   :  { %1022 = vmatpush1.bf16.msra.mxu0 %v1628_v18 }
  0x86   :  { %1063 = vmatpush1.bf16.msra.mxu1 %v1631_v21  ;;  %1023 = vmatprep.subr.bf16.mxu0 %v1636_v22 }
  0x87   :  { %1064 = vmatprep.subr.bf16.mxu1 %v1639_v23 }
  0x89   :  { %1024 = vmatpush1.bf16.msra.mxu0 %v1634_v24  ;;  %v487_v24 = vrot.slane %v154_v12, %v486_v16 }
  0x8a   :  { %1065 = vmatpush1.bf16.msra.mxu1 %v1637_v25  ;;  %1025 = vmatprep.subr.bf16.mxu0 %v1642_v26  ;;  %v490_v26 = vsub.s32 3, %v1987_v11 }
  0x8b   :  { %1066 = vmatprep.subr.bf16.mxu1 %v1645_v27 }
  0x8d   :  { %1026 = vmatpush1.bf16.msra.mxu0 %v1640_v28 }
  0x8e   :  { %1067 = vmatpush1.bf16.msra.mxu1 %v1643_v29  ;;  %1027 = vmatprep.subr.bf16.mxu0 %v1648_v30 }
  0x8f   :  { %1068 = vmatprep.subr.bf16.mxu1 %v1651_v31  ;;  %v491_v31 = vrot.slane %v154_v12, %v490_v26 }
  0x91   :  { %1028 = vmatpush1.bf16.msra.mxu0 %v1646_v32 }
  0x92   :  { %1069 = vmatpush1.bf16.msra.mxu1 %v1649_v33  ;;  %1029 = vmatprep.subr.bf16.mxu0 %v1654_v34 }
  0x93   :  { %1070 = vmatprep.subr.bf16.mxu1 %v1657_v35 }
  0x95   :  { %1030 = vmatpush1.bf16.msra.mxu0 %v1652_v36 }
  0x96   :  { %1071 = vmatpush1.bf16.msra.mxu1 %v1655_v37  ;;  %1031 = vmatprep.subr.bf16.mxu0 %v1660_v38 }
  0x97   :  { %1072 = vmatprep.subr.bf16.mxu1 %v1663_v39 }
  0x99   :  { %1032 = vmatpush1.bf16.msra.mxu0 %v1658_v40 }
  0x9a   :  { %1073 = vmatpush1.bf16.msra.mxu1 %v1661_v41  ;;  %1033 = vmatprep.subr.bf16.mxu0 %v1666_v43  ;;  %v2009_v41 = vld [vmem:[%s2072_s10] sm:$0x3] }
  0x9b   :  { %1074 = vmatprep.subr.bf16.mxu1 %v1669_v44 }
  0x9d   :  { %1034 = vmatpush1.bf16.msra.mxu0 %v1664_v45 }
  0x9e   :  { %1075 = vmatpush1.bf16.msra.mxu1 %v1667_v46  ;;  %1035 = vmatprep.subr.bf16.mxu0 %v1672_v47 }
  0x9f   :  { %1076 = vmatprep.subr.bf16.mxu1 %v1675_v48 }
  0xa1   :  { %1036 = vmatpush1.bf16.msra.mxu0 %v1670_v50 }
  0xa2   :  { %1077 = vmatpush1.bf16.msra.mxu1 %v1673_v51  ;;  %1037 = vmatprep.subr.bf16.mxu0 %v1678_v52 }
  0xa3   :  { %1078 = vmatprep.subr.bf16.mxu1 %v1681_v53  ;;  %v1708_v53 = vld [vmem:[#allocation9 + $0x4] ss:$8 sps:$4 sm:$0xff]  }
  0xa5   :  { %1038 = vmatpush1.bf16.msra.mxu0 %v1676_v54  ;;  %v1706_v54 = vld [vmem:[#allocation9] ss:$8 sps:$4 sm:$0xff]  }
  0xa6   :  { %1079 = vmatpush1.bf16.msra.mxu1 %v1679_v55  ;;  %1039 = vmatprep.subr.bf16.mxu0 %v1684_v56  ;;  %v1711_v55 = vld [vmem:[#allocation9 + $0x14] ss:$8 sps:$4 sm:$0xff]   ;;  %v1709_v56 = vld [vmem:[#allocation9 + $0x10] ss:$8 sps:$4 sm:$0xff]  }
  0xa7   :  { %1080 = vmatprep.subr.bf16.mxu1 %v1687_v57  ;;  %v1714_v57 = vld [vmem:[#allocation9 + $0x24] ss:$8 sps:$4 sm:$0xff]  }
  0xa9   :  { %1040 = vmatpush1.bf16.msra.mxu0 %v1682_v58  ;;  %v1712_v58 = vld [vmem:[#allocation9 + $0x20] ss:$8 sps:$4 sm:$0xff]  }
  0xaa   :  { %1081 = vmatpush1.bf16.msra.mxu1 %v1685_v59  ;;  %1041 = vmatprep.subr.bf16.mxu0 %v1690_v61  ;;  %v1717_v59 = vld [vmem:[#allocation9 + $0x34] ss:$8 sps:$4 sm:$0xff]   ;;  %v1720_v61 = vld [vmem:[#allocation9 + $0x44] ss:$8 sps:$4 sm:$0xff]  }
  0xab   :  { %1082 = vmatprep.subr.bf16.mxu1 %v1693_v63  ;;  %v1721_v63 = vld [vmem:[#allocation9 + $0x50] ss:$8 sps:$4 sm:$0xff]  }
  0xad   :  { %1042 = vmatpush1.bf16.msra.mxu0 %v1688_v60  ;;  %v1715_v60 = vld [vmem:[#allocation9 + $0x30] ss:$8 sps:$4 sm:$0xff]  }
  0xae   :  { %1083 = vmatpush1.bf16.msra.mxu1 %v1691_v62  ;;  %1043 = vmatprep.subr.bf16.mxu0 %v1696_v0  ;;  %v1718_v62 = vld [vmem:[#allocation9 + $0x40] ss:$8 sps:$4 sm:$0xff]   ;;  %v1723_v0 = vld [vmem:[#allocation9 + $0x54] ss:$8 sps:$4 sm:$0xff]  }
  0xaf   :  { %1084 = vmatprep.subr.bf16.mxu1 %v1699_v1  ;;  %v1726_v1 = vld [vmem:[#allocation9 + $0x64] ss:$8 sps:$4 sm:$0xff]  }
  0xb1   :  { %1044 = vmatpush1.bf16.msra.mxu0 %v1694_v2  ;;  %v1869_v2 = vmov 0  }
  0xb2   :  { %1085 = vmatpush1.bf16.msra.mxu1 %v1697_v3  ;;  %1045 = vmatprep.subr.bf16.mxu0 %v1702_v5  ;;  %v1724_v3 = vld [vmem:[#allocation9 + $0x60] ss:$8 sps:$4 sm:$0xff]   ;;  %v1727_v5 = vld [vmem:[#allocation9 + $0x70] ss:$8 sps:$4 sm:$0xff]  }
  0xb3   :  { %1086 = vmatprep.subr.bf16.mxu1 %v1705_v6  ;;  %v1420_v6 = vld [vmem:[%s2067_s5 + $0x4] sm:$0xf] }
  0xb4   :  { %v998_v7 = vrot.slane %v1420_v6, %v1990_v49 }
  0xb5   :  { %1046 = vmatpush1.bf16.msra.mxu0 %v1700_v8  ;;  %v1002_v8 = vrot.slane %v1420_v6, %v1996_v13 }
  0xb6   :  { %1087 = vmatpush1.bf16.msra.mxu1 %v1703_v9  ;;  %1244 = vmatprep.subr.bf16.mxu0 %v1708_v53 }
 0x14b   :  { %v530_v17 = vpop.f32.mrb[0].mxu0 }
 0x14c   :  { %v531_v18 = vadd.f32 %v530_v17, %v479_v14  ;;  %v532_v19 = vpop.f32.mrb[1].mxu0  ;;  %v571_v27 = vpop.f32.mrb[0].mxu1 }
 0x14d   :  { %v533_v20 = vadd.f32 %v532_v19, %v483_v15  ;;  %v534_v21 = vpop.f32.mrb[2].mxu0  ;;  %v573_v28 = vpop.f32.mrb[1].mxu1  ;;  %v572_v29 = vadd.f32 %v571_v27, %v487_v24  ;;  %v1010_v27 = vrot.slane %v1420_v6, %v490_v26 }
 0x14e   :  { %v1417_v22 = vmul.f32 -1.442695, %v531_v18  ;;  %v535_v23 = vpop.f32.mrb[3].mxu0  ;;  %v575_v30 = vpop.f32.mrb[2].mxu1  ;;  %v574_v34 = vadd.f32 %v573_v28, %v491_v31 }
 0x14f   :  { %v1418_v25 = vmul.f32 -1.442695, %v533_v20  ;;  %v576_v32 = vpop.f32.mrb[3].mxu1  ;;  %v1419_v33 = vmul.f32 -1.442695, %v572_v29 }
 0x150   :  { %1730 = vpow2.f32 %v1417_v22 }
 0x151   :  { %1732 = vpow2.f32 %v1418_v25  ;;  %v1006_v25 = vrot.slane %v1420_v6, %v486_v16 }
 0x152   :  { %1734 = vpow2.f32 %v1419_v33 }
 0x153   :  { %1736 = vtanh.f32 %v574_v34 }
 0x15a   :  { %v1731_v35 = vpop.eup %1730 }
 0x15b   :  { %v1733_v36 = vpop.eup %1732  ;;  %v587_v37 = vadd.f32 1.0, %v1731_v35 }
 0x15c   :  { %v588_v38 = vadd.f32 1.0, %v1733_v36  ;;  %v1735_v39 = vpop.eup %1734 }
 0x15d   :  { %1738 = vrcp.f32 %v587_v37  ;;  %v1737_v40 = vpop.eup %1736  ;;  %v589_v43 = vadd.f32 1.0, %v1735_v39  ;;  %v1117_v37 = vrot.slane %v2009_v41, 1 }
 0x15e   :  { %1740 = vrcp.f32 %v588_v38 }
 0x15f   :  { %1742 = vrcp.f32 %v589_v43 }
 0x167   :  { %v1739_v42 = vpop.eup %1738 }
 0x168   :  { %v1741_v44 = vpop.eup %1740  ;;  %v598_v45 = vmul.f32 %v1739_v42, %v1737_v40 }
 0x169   :  { %v597_v46 = vmul.f32 %v1741_v44, %v2009_v41  ;;  %v1743_v48 = vpop.eup %1742 }
 0x16b   :  { %v2012_v47 = vadd.f32 %v598_v45, %v597_v46 }
 0x16d   :  { %1744 = vtanh.f32 %v2012_v47 }
 0x177   :  { %v1745_v50 = vpop.eup %1744 }
 0x178   :  { %v2015_v51 = vmul.f32 %v1745_v50, %v1743_v48 }
 0x17a   :  { %v605_v52 = vpack.c.bf16 %v2015_v51, %v2015_v51 }
 0x17c   :  { %1048 = vmatmul.mubr.bf16.vlgmr.msra.gmra.mrb[4].mxu0 %v605_v52  ;;  %1089 = vmatmul.mubr.bf16.vlgmr.msra.gmra.mrb[4].mxu1 %v605_v52 }
 0x17d   :  { %1245 = vmatpush1.bf16.msra.mxu0 %v1706_v54  ;;  %1276 = vmatprep.mubr.bf16.mxu0 %v1869_v2 }
 0x17e   :  { %1246 = vmatprep.subr.bf16.mxu0 %v1711_v55 }
 0x181   :  { %1247 = vmatpush1.bf16.msra.mxu0 %v1709_v56 }
 0x182   :  { %1248 = vmatprep.subr.bf16.mxu0 %v1714_v57 }
 0x185   :  { %1249 = vmatpush1.bf16.msra.mxu0 %v1712_v58 }
 0x186   :  { %1250 = vmatprep.subr.bf16.mxu0 %v1717_v59 }
 0x189   :  { %1251 = vmatpush1.bf16.msra.mxu0 %v1715_v60 }
 0x18a   :  { %1252 = vmatprep.subr.bf16.mxu0 %v1720_v61 }
 0x18d   :  { %1253 = vmatpush1.bf16.msra.mxu0 %v1718_v62 }
 0x18e   :  { %1254 = vmatprep.subr.bf16.mxu0 %v1723_v0 }
 0x191   :  { %1255 = vmatpush1.bf16.msra.mxu0 %v1721_v63 }
 0x192   :  { %1256 = vmatprep.subr.bf16.mxu0 %v1726_v1 }
 0x195   :  { %1257 = vmatpush1.bf16.msra.mxu0 %v1724_v3 }
 0x196   :  { %1258 = vmatprep.subr.bf16.mxu0 %v1729_v4 }
 0x199   :  { %1259 = vmatpush1.bf16.msra.mxu0 %v1727_v5 }
 0x24f   :  { %v1049_v9 = vpop.f32.mrb[4].mxu0  ;;  %v1090_v12 = vpop.f32.mrb[4].mxu1 }
 0x250   :  { %v1050_v14 = vadd.f32 %v1049_v9, %v998_v7  ;;  %v1051_v15 = vpop.f32.mrb[5].mxu0  ;;  %v1092_v17 = vpop.f32.mrb[5].mxu1  ;;  %v1091_v28 = vadd.f32 %v1090_v12, %v1006_v25 }
 0x251   :  { %v1052_v18 = vadd.f32 %v1051_v15, %v1002_v8  ;;  %v1053_v19 = vpop.f32.mrb[6].mxu0  ;;  %v1094_v20 = vpop.f32.mrb[6].mxu1  ;;  %v1093_v29 = vadd.f32 %v1092_v17, %v1010_v27  ;;  %v1870_v8 = vmov 1966171168  }
 0x252   :  { %v1485_v21 = vmul.f32 -1.442695, %v1050_v14  ;;  %v1054_v22 = vpop.f32.mrb[7].mxu0  ;;  %v1095_v23 = vpop.f32.mrb[7].mxu1  ;;  %v1487_v30 = vmul.f32 -1.442695, %v1091_v28  ;;  %v1309_v9 = vunpack.c.l.s4 %v1870_v8 }
 0x253   :  { %v1486_v24 = vmul.f32 -1.442695, %v1052_v18 }
 0x254   :  { %1746 = vpow2.f32 %v1485_v21  ;;  %v1310_v12 = vunpack.c.0.s8 %v1309_v9 }
 0x255   :  { %1748 = vpow2.f32 %v1486_v24 }
 0x256   :  { %1750 = vtanh.f32 %v1093_v29  ;;  %v1313_v19 = vsub.s32 %v1310_v12, %v1987_v11 }
 0x257   :  { %1752 = vpow2.f32 %v1487_v30 }
 0x25e   :  { %v1747_v31 = vpop.eup %1746 }
 0x25f   :  { %v1106_v32 = vadd.f32 1.0, %v1747_v31  ;;  %v1749_v33 = vpop.eup %1748 }
 0x260   :  { %v1107_v34 = vadd.f32 1.0, %v1749_v33  ;;  %v1751_v35 = vpop.eup %1750 }
 0x261   :  { %1754 = vrcp.f32 %v1106_v32  ;;  %v1753_v36 = vpop.eup %1752 }
 0x262   :  { %1756 = vrcp.f32 %v1107_v34  ;;  %v1108_v40 = vadd.f32 1.0, %v1753_v36 }
 0x264   :  { %1758 = vrcp.f32 %v1108_v40 }
 0x26b   :  { %v1755_v16 = vpop.eup %1754 }
 0x26c   :  { %v1120_v38 = vmul.f32 %v1755_v16, %v1751_v35  ;;  %v1757_v39 = vpop.eup %1756 }
 0x26d   :  { %v1119_v26 = vmul.f32 %v1757_v39, %v1117_v37 }
 0x26e   :  { %v1759_v45 = vpop.eup %1758 }
 0x26f   :  { %v1121_v42 = vadd.f32 %v1120_v38, %v1119_v26 }
 0x271   :  { %1760 = vtanh.f32 %v1121_v42  ;;  %v1131_v43 = vrot.slane %v1121_v42, 7 }
 0x273   :  { %v1133_v44 = vsel %vm1127_vm0, %v2012_v47, %v1131_v43  ;;  %v1152_v47 = vld [vmem:[%s2069_s7] sm:$0x3]  ;;  %s1871_s7 = smov [#allocation10]  }
 0x274   :  { %1134 = vst [vmem:[%s2072_s10] sm:$0x3] %v1133_v44  ;;  %v1237_v53 = vrot.slane %v1152_v47, %v1990_v49  ;;  %v1241_v54 = vrot.slane %v1152_v47, %v1996_v13 }
 0x27b   :  { %v1761_v46 = vpop.eup %1760 }
 0x27c   :  { %v1123_v41 = vmul.f32 %v1761_v46, %v1759_v45 }
 0x27e   :  { %v1125_v48 = vrot.slane %v1123_v41, 7  ;;  %v1135_v50 = vpack.c.bf16 %v1123_v41, %v1123_v41 }
 0x280   :  { %1277 = vmatmul.mubr.bf16.vlgmr.msra.gmra.mrb[8].mxu0 %v1135_v50  ;;  %v1128_v52 = vsel %vm1127_vm0, %v2015_v51, %v1125_v48 }
 0x281   :  { %1129 = vst [vmem:[%s2071_s9] sm:$0x3] %v1128_v52  ;;  %s1334_s9 = sshll.u32 %s1871_s7, 4  ;;  %s1335_s9 = int_to_ptr.vmem [resolvable:$true] %s1334_s9 }
 0x282   :  { %s1834_s10 = scalar_lea.vmem %s1335_s9, 32  ;;  %p1839_p11 = scmp.lt.s32.totalorder %s1335_s9, %s1335_s9 }
 0x283   :  { %p1835_p10 = scmp.ne.s32.totalorder %s1335_s9, %s1834_s10  ;;  %p1840_p12 = scmp.lt.s32.totalorder %s1834_s10, %s1834_s10 }
 0x285   :  { %p1841_p13 = por %p1840_p12, %p1839_p11 }
 0x287   :  { %p1842_p0 = pnand %p1841_p13, %p1835_p10 }
 0x353   :  { %v1278_v55 = vpop.f32.mrb[8].mxu0 }
 0x354   :  { %v1279_v56 = vadd.f32 %v1278_v55, %v1237_v53  ;;  %v1280_v57 = vpop.f32.mrb[9].mxu0 }
 0x355   :  { %v1281_v58 = vadd.f32 %v1280_v57, %v1241_v54  ;;  %v1282_v59 = vpop.f32.mrb[10].mxu0 }
 0x356   :  { %v1283_v60 = vpop.f32.mrb[11].mxu0  ;;  %v1285_v51 = vsel %vm1127_vm0, %v1279_v56, -inf }
 0x357   :  { %v1286_v61 = vsel %vm1127_vm0, %v1281_v58, -inf }
 0x358   :  { %v1287_v62 = vmax.f32 %v1285_v51, %v1286_v61 }
 0x35a   :  { %1288 = vmax.xlane.f32.xlu0 %v1287_v62 }
 0x3e7   :  { %v1289_v63 = vpop.xlane.xlu0 %1288 }
 0x3e8   :  { %v1290_v0 = vsub.f32 %v1279_v56, %v1289_v63  ;;  %v1291_v1 = vsub.f32 %v1281_v58, %v1289_v63 }
 0x3ea   :  { %v1292_v2 = vmul.f32 1.442695, %v1290_v0  ;;  %v1294_v3 = vmul.f32 1.442695, %v1291_v1 }
 0x3ec   :  { %1762 = vpow2.f32 %v1292_v2 }
 0x3ed   :  { %1764 = vpow2.f32 %v1294_v3 }
 0x3f6   :  { %v1763_v49 = vpop.eup %1762 }
 0x3f7   :  { %v1765_v13 = vpop.eup %1764  ;;  %v1296_v4 = vsel %vm1127_vm0, %v1763_v49, 0.0 }
 0x3f8   :  { %v1297_v5 = vsel %vm1127_vm0, %v1765_v13, 0.0 }
 0x3f9   :  { %v1298_v6 = vadd.f32 %v1297_v5, %v1296_v4 }
 0x3fb   :  { %1299 = vadd.xlane.f32.xlu0 %v1298_v6 }
 0x488   :  { %v1300_v7 = vpop.xlane.xlu0 %1299 }
 0x489   :  { %1766 = vlog2.f32 %v1300_v7 }
 0x493   :  { %v1767_v14 = vpop.eup %1766 }
 0x494   :  { %v1302_v15 = vmul.f32 0.6931472, %v1767_v14 }
 0x496   :  { %v1303_v17 = vsub.f32 %v1290_v0, %v1302_v15  ;;  %v1304_v18 = vsub.f32 %v1291_v1, %v1302_v15 }
 0x498   :  { %v1307_v20 = vcombine.low %v1303_v17, %v1304_v18 }
 0x49a   :  { %v1314_v21 = vrot.slane %v1307_v20, %v1313_v19 }
 0x49c   :  { %v1321_v22 = vrot.slane %v1314_v21, %v1313_v19 }
 0x49e   :  { %1327 = vst.msk [vmem:[#allocation10] sm:$0x3] %vm1325_vm1, %v1321_v22 }
 0x49f   :  { %1845 = shalt.err (!%p1842_p0)
}
 0x4a0   :  { %s1846_s6 = scalar_lea.hbm %s2070_s8, 32 }
 0x4a1   :  { %p1847_p1 = scmp.ne.s32.totalorder %s2070_s8, %s1846_s6  ;;  %p1850_p2 = scmp.lt.u32.totalorder %s1846_s6, %s2070_s8 }
 0x4a3   :  { %p1852_p3 = pnand %p1850_p2, %p1847_p1 }
 0x4a5   :  { %1855 = shalt.err (!%p1852_p3)
}
 0x4a6   :  { %1337 = dma.vmem_to_hbm [thread:$0]  %s1335_s9, 32, %s2070_s8, [#allocation6]  }
 0x4a7   :  { %1860 = dma.done.wait [#allocation6], 32  }
 0x4a8   :  { %1861 = vsyncadd [#allocation6], 4294967264 }
 0x4a9   :  { %1349 = vsyncpa [#allocation5], 1 }
 0x4aa   :  { %1350 = vsyncpa [#allocation8], 1 }
 0x4ab   :  { %1351 = vsyncpa [#allocation6], 1 }

</bundles_post_ra>
